<compile_context>
chip_gen: v5e
topology: v5e:2x2
jax: 0.10.0
libtpu: 0.0.40
codegen_flags: <defaults>
</compile_context>

<pallas_src>
import functools

import jax
import jax.numpy as jnp
from jax.experimental import pallas as pl
from jax.experimental.pallas import tpu as pltpu


def _round_up(x, m):
    return (x + m - 1) // m * m


def _aligned_dims(d_model, d_ff, tile_f, align):
    """MXU/lane-aligned padded feature dims and the d_ff chunk size used."""
    dp = _round_up(d_model, align)
    tf = min(_round_up(tile_f, align), _round_up(d_ff, align))
    fp = _round_up(d_ff, tf)
    return dp, fp, tf


# ---------------------------------------------------------------------------
# Kernels.  Grid = (i: row tiles, k: d_ff chunks); k is the reduction axis.
# ---------------------------------------------------------------------------

def _ffn_kernel_scratch(x_ref, w1_ref, b1_ref, w2_ref, b2_ref, o_ref, acc_ref):
    """Low-precision output path: accumulate in f32 VMEM scratch, cast at end."""
    k = pl.program_id(1)

    @pl.when(k == 0)
    def _():
        acc_ref[...] = jnp.broadcast_to(
            b2_ref[...].astype(jnp.float32), acc_ref.shape)

    h = jnp.dot(x_ref[...], w1_ref[...], preferred_element_type=jnp.float32)
    h = jnp.maximum(h + b1_ref[...].astype(jnp.float32), 0.0)
    acc_ref[...] += jnp.dot(h.astype(w2_ref.dtype), w2_ref[...],
                            preferred_element_type=jnp.float32)

    @pl.when(k == pl.num_programs(1) - 1)
    def _():
        o_ref[...] = acc_ref[...].astype(o_ref.dtype)


def _ffn_kernel_inplace(x_ref, w1_ref, b1_ref, w2_ref, b2_ref, o_ref):
    """f32 output path: accumulate directly into the resident output tile."""
    k = pl.program_id(1)

    @pl.when(k == 0)
    def _():
        o_ref[...] = jnp.broadcast_to(
            b2_ref[...].astype(jnp.float32), o_ref.shape)

    h = jnp.dot(x_ref[...], w1_ref[...], preferred_element_type=jnp.float32)
    h = jnp.maximum(h + b1_ref[...].astype(jnp.float32), 0.0)
    o_ref[...] += jnp.dot(h.astype(w2_ref.dtype), w2_ref[...],
                          preferred_element_type=jnp.float32)


# ---------------------------------------------------------------------------
# Host-side wrappers.
# ---------------------------------------------------------------------------

def pad_params(w1, b1, w2, b2, *, tile_f=512, align=256):
    """Pad weights ONCE at init time (zero padding is numerically inert).

    Avoids re-materializing padded weight copies in HBM on every forward call.
    """
    d_model, d_ff = w1.shape
    dp, fp, _ = _aligned_dims(d_model, d_ff, tile_f, align)
    w1p = jnp.pad(w1, ((0, dp - d_model), (0, fp - d_ff)))
    b1p = jnp.pad(b1.reshape(1, d_ff), ((0, 0), (0, fp - d_ff)))
    w2p = jnp.pad(w2, ((0, fp - d_ff), (0, dp - d_model)))
    b2p = jnp.pad(b2.reshape(1, d_model), ((0, 0), (0, dp - d_model)))
    return w1p, b1p, w2p, b2p


@functools.partial(
    jax.jit, static_argnames=("tile_m", "tile_f", "align", "vmem_limit_bytes"))
def feed_forward(x, w1, b1, w2, b2, *, tile_m=512, tile_f=512, align=256,
                 vmem_limit_bytes=None):
    """relu(x @ w1 + b1) @ w2 + b2  (PyTorch Linear/ReLU/Linear, weights (in, out)).

    Weights may be passed pre-padded via pad_params() (recommended); otherwise
    they are padded in-line (extra HBM traffic per call).
    """
    B, S, d_model = x.shape
    M = B * S

    # ---- feature alignment (256 -> full 256x256 MXU on v6e/v7x) ----
    Dp, Fp, tile_f = _aligned_dims(max(d_model, w1.shape[0]), w1.shape[1],
                                   tile_f, align)

    b1 = b1.reshape(1, -1)
    b2 = b2.reshape(1, -1)
    # Static shape checks: no-ops when pad_params() was used.
    if w1.shape != (Dp, Fp):
        w1 = jnp.pad(w1, ((0, Dp - w1.shape[0]), (0, Fp - w1.shape[1])))
    if b1.shape != (1, Fp):
        b1 = jnp.pad(b1, ((0, 0), (0, Fp - b1.shape[1])))
    if w2.shape != (Fp, Dp):
        w2 = jnp.pad(w2, ((0, Fp - w2.shape[0]), (0, Dp - w2.shape[1])))
    if b2.shape != (1, Dp):
        b2 = jnp.pad(b2, ((0, 0), (0, Dp - b2.shape[1])))

    # ---- row tiling: large tile_m amortizes weight re-streaming; keep >= 2
    # row tiles when possible so the "parallel" axis feeds both v7x cores ----
    tile_m = min(tile_m, _round_up(M, 128))
    if tile_m >= 256 and _round_up(M, tile_m) // tile_m < 2:
        half = _round_up(tile_m // 2, 128)
        if _round_up(M, half) // half >= 2:
            tile_m = half
    Mp = _round_up(M, tile_m)

    # Activations: padded per call (zeros -> padded rows/cols sliced off below).
    x2d = jnp.pad(x.reshape(M, d_model), ((0, Mp - M), (0, Dp - d_model)))

    grid = (Mp // tile_m, Fp // tile_f)
    out_dtype = x.dtype
    use_scratch = jnp.dtype(out_dtype) != jnp.dtype(jnp.float32)

    # ---- scoped-VMEM budget from the actual double-buffered tile footprint ----
    if vmem_limit_bytes is None:
        xb = jnp.dtype(x.dtype).itemsize
        wb = jnp.dtype(w1.dtype).itemsize
        ob = jnp.dtype(out_dtype).itemsize
        footprint = 2 * (tile_m * Dp * xb        # x tile
                         + Dp * tile_f * wb      # W1 chunk
                         + tile_f * Dp * wb      # W2 chunk
                         + tile_m * Dp * ob      # output tile
                         + 8 * tile_f * wb       # b1 chunk (sublane-padded)
                         + 8 * Dp * wb)          # b2
        if use_scratch:
            footprint += tile_m * Dp * 4         # f32 accumulator scratch
        vmem_limit_bytes = max(32 << 20,
                               min(int(footprint * 1.25) + (4 << 20), 120 << 20))

    in_specs = [
        # Activations: new row tile per i, constant over the reduction.
        pl.BlockSpec((tile_m, Dp), lambda i, k: (i, 0)),
        # W1 chunk along d_ff (streamed; overlaps MXU via double buffering).
        pl.BlockSpec((Dp, tile_f), lambda i, k: (0, k)),
        # b1 chunk, lane-aligned.
        pl.BlockSpec((1, tile_f), lambda i, k: (0, k)),
        # W2 chunk along d_ff.
        pl.BlockSpec((tile_f, Dp), lambda i, k: (k, 0)),
        # b2 (folded into accumulator init).
        pl.BlockSpec((1, Dp), lambda i, k: (0, 0)),
    ]
    # Output tile revisited across the reduction axis (resident accumulator).
    out_spec = pl.BlockSpec((tile_m, Dp), lambda i, k: (i, 0))

    kernel = _ffn_kernel_scratch if use_scratch else _ffn_kernel_inplace
    scratch_shapes = ([pltpu.VMEM((tile_m, Dp), jnp.float32)]
                      if use_scratch else [])

    out2d = pl.pallas_call(
        kernel,
        out_shape=jax.ShapeDtypeStruct((Mp, Dp), out_dtype),
        grid_spec=pltpu.PrefetchScalarGridSpec(
            num_scalar_prefetch=0,
            grid=grid,
            in_specs=in_specs,
            out_specs=out_spec,
            scratch_shapes=scratch_shapes,
        ),
        compiler_params=pltpu.CompilerParams(
            dimension_semantics=("parallel", "arbitrary"),
            vmem_limit_bytes=vmem_limit_bytes,
        ),
    )(x2d, w1, b1, w2, b2)

    return out2d[:M, :d_model].reshape(B, S, d_model)


def init_params(key, d_model, d_ff, dtype=jnp.float32):
    """nn.Linear-style init: U(-1/sqrt(fan_in), 1/sqrt(fan_in)); weights (in, out)."""
    k1, k2, k3, k4 = jax.random.split(key, 4)
    lim1 = 1.0 / jnp.sqrt(d_model)
    lim2 = 1.0 / jnp.sqrt(d_ff)
    w1 = jax.random.uniform(k1, (d_model, d_ff), dtype, -lim1, lim1)
    b1 = jax.random.uniform(k2, (d_ff,), dtype, -lim1, lim1)
    w2 = jax.random.uniform(k3, (d_ff, d_model), dtype, -lim2, lim2)
    b2 = jax.random.uniform(k4, (d_model,), dtype, -lim2, lim2)
    return w1, b1, w2, b2


if __name__ == "__main__":
    key = jax.random.PRNGKey(0)
    batch, seq, d_model, d_ff = 2, 8, 32, 64

    kx, kp = jax.random.split(key)
    x = jax.random.normal(kx, (batch, seq, d_model), jnp.float32)
    w1, b1, w2, b2 = init_params(kp, d_model, d_ff)

    # Pad weights once at init (production path); per-call work pads x only.
    w1p, b1p, w2p, b2p = pad_params(w1, b1, w2, b2)

    # f32 path (in-place accumulation into the output tile) — tight check.
    out = jax.block_until_ready(feed_forward(x, w1p, b1p, w2p, b2p))
    ref = jnp.maximum(x @ w1 + b1, 0.0) @ w2 + b2
    assert out.shape == (batch, seq, d_model)
    assert jnp.allclose(out, ref, atol=1e-5, rtol=1e-5)

    # bf16 production path (f32 scratch accumulator inside the kernel) — loose check.
    xb = x.astype(jnp.bfloat16)
    pb = pad_params(*(p.astype(jnp.bfloat16) for p in (w1, b1, w2, b2)))
    out_bf16 = jax.block_until_ready(feed_forward(xb, *pb))
    assert out_bf16.shape == (batch, seq, d_model)
    assert out_bf16.dtype == jnp.bfloat16
    assert jnp.allclose(out_bf16.astype(jnp.float32), ref, atol=5e-2, rtol=5e-2)

    print("KERNEL_OK")
</pallas_src>

<mosaic_0001>
module attributes {stable_mosaic.version = 11 : i64} {
  func.func @_ffn_kernel_inplace(%arg0: i32, %arg1: i32, %arg2: memref<128x256xf32, #tpu.memory_space<vmem>>, %arg3: memref<256x256xf32, #tpu.memory_space<vmem>>, %arg4: memref<1x256xf32, #tpu.memory_space<vmem>>, %arg5: memref<256x256xf32, #tpu.memory_space<vmem>>, %arg6: memref<1x256xf32, #tpu.memory_space<vmem>>, %arg7: memref<128x256xf32, #tpu.memory_space<vmem>>) attributes {dimension_semantics = [#tpu.dimension_semantics<parallel>, #tpu.dimension_semantics<arbitrary>], iteration_bounds = array<i64: 1, 1>, scalar_prefetch = 0 : i64, scratch_operands = 0 : i64, tpu.core_type = #tpu.core_type<tc>, window_params = [{transform_indices = @transform_0, window_bounds = array<i64: 128, 256>}, {transform_indices = @transform_1, window_bounds = array<i64: 256, 256>}, {transform_indices = @transform_2, window_bounds = array<i64: 1, 256>}, {transform_indices = @transform_3, window_bounds = array<i64: 256, 256>}, {pipeline_mode = #tpu.pipeline_mode<synchronous>, transform_indices = @transform_4, window_bounds = array<i64: 1, 256>}, {transform_indices = @transform_5, window_bounds = array<i64: 128, 256>}]} {
    %c0_i32 = arith.constant 0 : i32
    %0 = arith.cmpi eq, %arg1, %c0_i32 : i32
    %1 = arith.extui %0 : i1 to i32
    %c0_i32_0 = arith.constant 0 : i32
    %2 = arith.cmpi ne, %1, %c0_i32_0 : i32
    scf.if %2 {
      %c0_14 = arith.constant 0 : index
      %c0_15 = arith.constant 0 : index
      %16 = vector.load %arg6[%c0_14, %c0_15] : memref<1x256xf32, #tpu.memory_space<vmem>>, vector<1x256xf32>
      %17 = vector.shape_cast %16 : vector<1x256xf32> to vector<1x256xf32>
      %18 = vector.broadcast %17 : vector<1x256xf32> to vector<128x256xf32>
      %c0_16 = arith.constant 0 : index
      %c0_17 = arith.constant 0 : index
      %19 = vector.load %arg7[%c0_16, %c0_17] : memref<128x256xf32, #tpu.memory_space<vmem>>, vector<128x256xf32>
      tpu.vector_store %arg7[%c0_16, %c0_17], %18 {strides = array<i32>} : memref<128x256xf32, #tpu.memory_space<vmem>>, vector<128x256xf32>,
    } else {
    }
    %c0 = arith.constant 0 : index
    %c0_1 = arith.constant 0 : index
    %3 = vector.load %arg2[%c0, %c0_1] : memref<128x256xf32, #tpu.memory_space<vmem>>, vector<128x256xf32>
    %c0_2 = arith.constant 0 : index
    %c0_3 = arith.constant 0 : index
    %4 = vector.load %arg3[%c0_2, %c0_3] : memref<256x256xf32, #tpu.memory_space<vmem>>, vector<256x256xf32>
    %cst = arith.constant dense<0.000000e+00> : vector<128x256xf32>
    %5 = tpu.matmul %3, %4, %cst {dimension_numbers = #tpu.dot_dimension_numbers<[1], [0], [0], [1], [0, 0, 1, 1], [], []>} : vector<128x256xf32>, vector<256x256xf32>, vector<128x256xf32> -> vector<128x256xf32>
    %c0_4 = arith.constant 0 : index
    %c0_5 = arith.constant 0 : index
    %6 = vector.load %arg4[%c0_4, %c0_5] : memref<1x256xf32, #tpu.memory_space<vmem>>, vector<1x256xf32>
    %7 = vector.broadcast %6 : vector<1x256xf32> to vector<128x256xf32>
    %8 = arith.addf %5, %7 : vector<128x256xf32>
    %cst_6 = arith.constant 0.000000e+00 : f32
    %9 = vector.broadcast %cst_6 : f32 to vector<128x256xf32>
    %10 = arith.maximumf %8, %9 : vector<128x256xf32>
    %c0_7 = arith.constant 0 : index
    %c0_8 = arith.constant 0 : index
    %11 = vector.load %arg7[%c0_7, %c0_8] : memref<128x256xf32, #tpu.memory_space<vmem>>, vector<128x256xf32>
    %c0_9 = arith.constant 0 : index
    %c0_10 = arith.constant 0 : index
    %12 = vector.load %arg5[%c0_9, %c0_10] : memref<256x256xf32, #tpu.memory_space<vmem>>, vector<256x256xf32>
    %cst_11 = arith.constant dense<0.000000e+00> : vector<128x256xf32>
    %13 = tpu.matmul %10, %12, %cst_11 {dimension_numbers = #tpu.dot_dimension_numbers<[1], [0], [0], [1], [0, 0, 1, 1], [], []>} : vector<128x256xf32>, vector<256x256xf32>, vector<128x256xf32> -> vector<128x256xf32>
    %14 = arith.addf %11, %13 : vector<128x256xf32>
    %c0_12 = arith.constant 0 : index
    %c0_13 = arith.constant 0 : index
    %15 = vector.load %arg7[%c0_12, %c0_13] : memref<128x256xf32, #tpu.memory_space<vmem>>, vector<128x256xf32>
    tpu.vector_store %arg7[%c0_12, %c0_13], %14 {strides = array<i32>} : memref<128x256xf32, #tpu.memory_space<vmem>>, vector<128x256xf32>,
    return
  }
  func.func @transform_0(%arg0: i32, %arg1: i32) -> (i32, i32) {
    %c0_i32 = arith.constant 0 : i32
    %c0_i32_0 = arith.constant 0 : i32
    return %arg0, %c0_i32 : i32, i32
  }
  func.func @transform_1(%arg0: i32, %arg1: i32) -> (i32, i32) {
    %c0_i32 = arith.constant 0 : i32
    %c0_i32_0 = arith.constant 0 : i32
    return %c0_i32, %arg1 : i32, i32
  }
  func.func @transform_2(%arg0: i32, %arg1: i32) -> (i32, i32) {
    %c0_i32 = arith.constant 0 : i32
    %c0_i32_0 = arith.constant 0 : i32
    return %c0_i32, %arg1 : i32, i32
  }
  func.func @transform_3(%arg0: i32, %arg1: i32) -> (i32, i32) {
    %c0_i32 = arith.constant 0 : i32
    %c0_i32_0 = arith.constant 0 : i32
    return %arg1, %c0_i32 : i32, i32
  }
  func.func @transform_4(%arg0: i32, %arg1: i32) -> (i32, i32) {
    %c0_i32 = arith.constant 0 : i32
    %c0_i32_0 = arith.constant 0 : i32
    %c0_i32_1 = arith.constant 0 : i32
    return %c0_i32, %c0_i32_0 : i32, i32
  }
  func.func @transform_5(%arg0: i32, %arg1: i32) -> (i32, i32) {
    %c0_i32 = arith.constant 0 : i32
    %c0_i32_0 = arith.constant 0 : i32
    return %arg0, %c0_i32 : i32, i32
  }
}

</mosaic_0001>

<bundles_post_ra>
// kernel: feed_forward.1
= control target key start
LH: loop header
LB: loop body
LE: loop exit
PB: predicated region body
PF: predicated region fallthrough
CT: control target
= control target key end

     0   :  { %10 = vsyncpa [#allocation3], 0  ;;  %s1280_s0 = inlined_call_operand.vmem [shape: f32[128,256], index: 0, kind: input, shape index: {}]   ;;  %s1281_s1 = inlined_call_operand.hbm [shape: f32[256,256], index: 1, kind: input, shape index: {}]   ;;  %s1282_s2 = inlined_call_operand.vmem [shape: f32[1,256], index: 2, kind: input, shape index: {}]   ;;  %s1283_s3 = inlined_call_operand.hbm [shape: f32[256,256], index: 3, kind: input, shape index: {}]   ;;  %s1284_s4 = inlined_call_operand.vmem [shape: f32[1,256], index: 4, kind: input, shape index: {}]   ;;  %s1285_s5 = inlined_call_operand.vmem [shape: f32[128,256], index: 5, kind: output, shape index: {}]  }
   0x1   :  { %s18_s20 = sshll.u32 %s1281_s1, 4  ;;  %s19_s20 = int_to_ptr.hbm [resolvable:$true] %s18_s20 }
   0x2   :  { %11 = vsyncpa [#allocation5], 0  ;;  %s970_s21 = smov [#allocation2]   ;;  %s33_s25 = sshll.u32 %s1283_s3, 4  ;;  %s34_s25 = int_to_ptr.hbm [resolvable:$true] %s33_s25 }
   0x3   :  { %s20_s22 = sshll.u32 %s970_s21, 4  ;;  %s971_s26 = smov 256   ;;  %s21_s22 = int_to_ptr.vmem [resolvable:$true] %s20_s22 }
   0x4   :  { %s972_s27 = smov 16   ;;  %s973_s28 = smov [#allocation4]  }
   0x5   :  { %26 = dma.hbm_to_vmem [thread:$0]  %s19_s20, 8192, %s21_s22, [#allocation3], %s971_s26, %s971_s26, %s972_s27  }
   0x6   :  { %s35_s29 = sshll.u32 %s973_s28, 4  ;;  %s36_s29 = int_to_ptr.vmem [resolvable:$true] %s35_s29 }
   0x7   :  { %41 = dma.hbm_to_vmem [thread:$0]  %s34_s25, 8192, %s36_s29, [#allocation5], %s971_s26, %s971_s26, %s972_s27  }
   0x8   :  { %966 = dma.done.wait [#allocation3], 8192  }
   0x9   :  { %967 = vsyncadd [#allocation3], 4294959104 }
   0xa   :  { %968 = dma.done.wait [#allocation5], 8192  }
   0xb   :  { %969 = vsyncadd [#allocation5], 4294959104  ;;  %v157_v0 = vld [vmem:[#allocation2 + $0xf8] sm:$0xff]  ;;  %v155_v1 = vld [vmem:[#allocation2 + $0xe8] sm:$0xff] }
   0xc   :  { %v189_v2 = vld [vmem:[#allocation2 + $0x1f8] sm:$0xff]  ;;  %326 = vmatpush.msra.mxu2 %v157_v0  ;;  %v187_v3 = vld [vmem:[#allocation2 + $0x1e8] sm:$0xff]  ;;  %v156_v4 = vld [vmem:[#allocation2 + $0xf0] sm:$0xff] }
   0xd   :  { %391 = vmatpush.msra.mxu3 %v189_v2  ;;  %v153_v5 = vld [vmem:[#allocation2 + $0xd8] sm:$0xff]  ;;  %196 = vmatpush.msra.mxu0 %v156_v4  ;;  %v154_v7 = vld [vmem:[#allocation2 + $0xe0] sm:$0xff]  ;;  %v151_v8 = vld [vmem:[#allocation2 + $0xc8] sm:$0xff] }
   0xe   :  { %v185_v6 = vld [vmem:[#allocation2 + $0x1d8] sm:$0xff]  ;;  %327 = vmatpush.msra.mxu2 %v155_v1  ;;  %v188_v9 = vld [vmem:[#allocation2 + $0x1f0] sm:$0xff]  ;;  %v183_v10 = vld [vmem:[#allocation2 + $0x1c8] sm:$0xff] }
   0xf   :  { %392 = vmatpush.msra.mxu3 %v187_v3  ;;  %197 = vmatpush.msra.mxu0 %v154_v7  ;;  %v152_v11 = vld [vmem:[#allocation2 + $0xd0] sm:$0xff]  ;;  %v186_v12 = vld [vmem:[#allocation2 + $0x1e0] sm:$0xff]  ;;  %v149_v15 = vld [vmem:[#allocation2 + $0xb8] sm:$0xff] }
  0x10   :  { %261 = vmatpush.msra.mxu1 %v188_v9  ;;  %328 = vmatpush.msra.mxu2 %v153_v5  ;;  %v150_v13 = vld [vmem:[#allocation2 + $0xc0] sm:$0xff]  ;;  %v184_v14 = vld [vmem:[#allocation2 + $0x1d0] sm:$0xff]  ;;  %v181_v16 = vld [vmem:[#allocation2 + $0x1b8] sm:$0xff] }
  0x11   :  { %393 = vmatpush.msra.mxu3 %v185_v6  ;;  %198 = vmatpush.msra.mxu0 %v152_v11  ;;  %v148_v17 = vld [vmem:[#allocation2 + $0xb0] sm:$0xff]  ;;  %v182_v18 = vld [vmem:[#allocation2 + $0x1c0] sm:$0xff]  ;;  %v147_v19 = vld [vmem:[#allocation2 + $0xa8] sm:$0xff] }
  0x12   :  { %262 = vmatpush.msra.mxu1 %v186_v12  ;;  %329 = vmatpush.msra.mxu2 %v151_v8  ;;  %v179_v20 = vld [vmem:[#allocation2 + $0x1a8] sm:$0xff]  ;;  %v146_v21 = vld [vmem:[#allocation2 + $0xa0] sm:$0xff]  ;;  %v180_v22 = vld [vmem:[#allocation2 + $0x1b0] sm:$0xff] }
  0x13   :  { %394 = vmatpush.msra.mxu3 %v183_v10  ;;  %199 = vmatpush.msra.mxu0 %v150_v13  ;;  %v145_v23 = vld [vmem:[#allocation2 + $0x98] sm:$0xff]  ;;  %v144_v25 = vld [vmem:[#allocation2 + $0x90] sm:$0xff]  ;;  %v178_v26 = vld [vmem:[#allocation2 + $0x1a0] sm:$0xff] }
  0x14   :  { %263 = vmatpush.msra.mxu1 %v184_v14  ;;  %330 = vmatpush.msra.mxu2 %v149_v15  ;;  %v177_v24 = vld [vmem:[#allocation2 + $0x198] sm:$0xff]  ;;  %v143_v27 = vld [vmem:[#allocation2 + $0x88] sm:$0xff]  ;;  %v142_v29 = vld [vmem:[#allocation2 + $0x80] sm:$0xff] }
  0x15   :  { %395 = vmatpush.msra.mxu3 %v181_v16  ;;  %200 = vmatpush.msra.mxu0 %v148_v17  ;;  %v175_v28 = vld [vmem:[#allocation2 + $0x188] sm:$0xff]  ;;  %v176_v30 = vld [vmem:[#allocation2 + $0x190] sm:$0xff]  ;;  %v141_v31 = vld [vmem:[#allocation2 + $0x78] sm:$0xff] }
  0x16   :  { %264 = vmatpush.msra.mxu1 %v182_v18  ;;  %331 = vmatpush.msra.mxu2 %v147_v19  ;;  %v173_v32 = vld [vmem:[#allocation2 + $0x178] sm:$0xff]  ;;  %v140_v33 = vld [vmem:[#allocation2 + $0x70] sm:$0xff]  ;;  %v174_v34 = vld [vmem:[#allocation2 + $0x180] sm:$0xff] }
  0x17   :  { %396 = vmatpush.msra.mxu3 %v179_v20  ;;  %201 = vmatpush.msra.mxu0 %v146_v21  ;;  %v139_v35 = vld [vmem:[#allocation2 + $0x68] sm:$0xff]  ;;  %v138_v37 = vld [vmem:[#allocation2 + $0x60] sm:$0xff]  ;;  %v172_v38 = vld [vmem:[#allocation2 + $0x170] sm:$0xff] }
  0x18   :  { %265 = vmatpush.msra.mxu1 %v180_v22  ;;  %332 = vmatpush.msra.mxu2 %v145_v23  ;;  %v171_v36 = vld [vmem:[#allocation2 + $0x168] sm:$0xff]  ;;  %v137_v39 = vld [vmem:[#allocation2 + $0x58] sm:$0xff]  ;;  %v136_v41 = vld [vmem:[#allocation2 + $0x50] sm:$0xff] }
  0x19   :  { %397 = vmatpush.msra.mxu3 %v177_v24  ;;  %202 = vmatpush.msra.mxu0 %v144_v25  ;;  %v169_v40 = vld [vmem:[#allocation2 + $0x158] sm:$0xff]  ;;  %v170_v42 = vld [vmem:[#allocation2 + $0x160] sm:$0xff]  ;;  %v135_v43 = vld [vmem:[#allocation2 + $0x48] sm:$0xff] }
  0x1a   :  { %266 = vmatpush.msra.mxu1 %v178_v26  ;;  %333 = vmatpush.msra.mxu2 %v143_v27  ;;  %v167_v44 = vld [vmem:[#allocation2 + $0x148] sm:$0xff]  ;;  %v134_v45 = vld [vmem:[#allocation2 + $0x40] sm:$0xff]  ;;  %v168_v46 = vld [vmem:[#allocation2 + $0x150] sm:$0xff] }
  0x1b   :  { %398 = vmatpush.msra.mxu3 %v175_v28  ;;  %203 = vmatpush.msra.mxu0 %v142_v29  ;;  %v133_v47 = vld [vmem:[#allocation2 + $0x38] sm:$0xff]  ;;  %v132_v49 = vld [vmem:[#allocation2 + $0x30] sm:$0xff]  ;;  %v166_v50 = vld [vmem:[#allocation2 + $0x140] sm:$0xff] }
  0x1c   :  { %267 = vmatpush.msra.mxu1 %v176_v30  ;;  %334 = vmatpush.msra.mxu2 %v141_v31  ;;  %v165_v48 = vld [vmem:[#allocation2 + $0x138] sm:$0xff]  ;;  %v131_v51 = vld [vmem:[#allocation2 + $0x28] sm:$0xff]  ;;  %v130_v53 = vld [vmem:[#allocation2 + $0x20] sm:$0xff] }
  0x1d   :  { %399 = vmatpush.msra.mxu3 %v173_v32  ;;  %204 = vmatpush.msra.mxu0 %v140_v33  ;;  %v163_v52 = vld [vmem:[#allocation2 + $0x128] sm:$0xff]  ;;  %v164_v54 = vld [vmem:[#allocation2 + $0x130] sm:$0xff]  ;;  %v129_v55 = vld [vmem:[#allocation2 + $0x18] sm:$0xff] }
  0x1e   :  { %268 = vmatpush.msra.mxu1 %v174_v34  ;;  %335 = vmatpush.msra.mxu2 %v139_v35  ;;  %v161_v56 = vld [vmem:[#allocation2 + $0x118] sm:$0xff]  ;;  %v128_v57 = vld [vmem:[#allocation2 + $0x10] sm:$0xff]  ;;  %v162_v58 = vld [vmem:[#allocation2 + $0x120] sm:$0xff] }
  0x1f   :  { %400 = vmatpush.msra.mxu3 %v171_v36  ;;  %205 = vmatpush.msra.mxu0 %v138_v37  ;;  %v127_v59 = vld [vmem:[#allocation2 + $0x8] sm:$0xff]  ;;  %v94_v61 = vld [vmem:[%s1280_s0] sm:$0xff]  ;;  %v160_v0 = vld [vmem:[#allocation2 + $0x110] sm:$0xff] }
  0x20   :  { %269 = vmatpush.msra.mxu1 %v172_v38  ;;  %336 = vmatpush.msra.mxu2 %v137_v39  ;;  %v159_v60 = vld [vmem:[#allocation2 + $0x108] sm:$0xff]  ;;  %v126_v63 = vld [vmem:[#allocation2] sm:$0xff]  ;;  %v551_v1 = vld [vmem:[#allocation4 + $0xf8] sm:$0xff] }
  0x21   :  { %401 = vmatpush.msra.mxu3 %v169_v40  ;;  %206 = vmatpush.msra.mxu0 %v136_v41  ;;  %v95_v62 = vld [vmem:[%s1280_s0 + $0x8] sm:$0xff]  ;;  %v158_v2 = vld [vmem:[#allocation2 + $0x100] sm:$0xff]  ;;  %v583_v3 = vld [vmem:[#allocation4 + $0x1f8] sm:$0xff] }
  0x22   :  { %270 = vmatpush.msra.mxu1 %v170_v42  ;;  %337 = vmatpush.msra.mxu2 %v135_v43  ;;  %v550_v4 = vld [vmem:[#allocation4 + $0xf0] sm:$0xff]  ;;  %v549_v6 = vld [vmem:[#allocation4 + $0xe8] sm:$0xff]  ;;  %v548_v8 = vld [vmem:[#allocation4 + $0xe0] sm:$0xff] }
  0x23   :  { %402 = vmatpush.msra.mxu3 %v167_v44  ;;  %207 = vmatpush.msra.mxu0 %v134_v45  ;;  %v582_v5 = vld [vmem:[#allocation4 + $0x1f0] sm:$0xff]  ;;  %v581_v7 = vld [vmem:[#allocation4 + $0x1e8] sm:$0xff]  ;;  %v580_v9 = vld [vmem:[#allocation4 + $0x1e0] sm:$0xff] }
  0x24   :  { %271 = vmatpush.msra.mxu1 %v168_v46  ;;  %338 = vmatpush.msra.mxu2 %v133_v47  ;;  %v547_v10 = vld [vmem:[#allocation4 + $0xd8] sm:$0xff]  ;;  %v96_v11 = vld [vmem:[%s1280_s0 + $0x10] sm:$0xff]  ;;  %v545_v16 = vld [vmem:[#allocation4 + $0xc8] sm:$0xff] }
  0x25   :  { %403 = vmatpush.msra.mxu3 %v165_v48  ;;  %208 = vmatpush.msra.mxu0 %v132_v49  ;;  %v97_v12 = vld [vmem:[%s1280_s0 + $0x18] sm:$0xff]  ;;  %v546_v14 = vld [vmem:[#allocation4 + $0xd0] sm:$0xff]  ;;  %v577_v17 = vld [vmem:[#allocation4 + $0x1c8] sm:$0xff] }
  0x26   :  { %272 = vmatpush.msra.mxu1 %v166_v50  ;;  %339 = vmatpush.msra.mxu2 %v131_v51  ;;  %v579_v13 = vld [vmem:[#allocation4 + $0x1d8] sm:$0xff]  ;;  %v578_v15 = vld [vmem:[#allocation4 + $0x1d0] sm:$0xff]  ;;  %v544_v18 = vld [vmem:[#allocation4 + $0xc0] sm:$0xff] }
  0x27   :  { %404 = vmatpush.msra.mxu3 %v163_v52  ;;  %209 = vmatpush.msra.mxu0 %v130_v53  ;;  %v576_v19 = vld [vmem:[#allocation4 + $0x1c0] sm:$0xff]  ;;  %v543_v20 = vld [vmem:[#allocation4 + $0xb8] sm:$0xff]  ;;  %v99_v23 = vld [vmem:[%s1280_s0 + $0x28] sm:$0xff] }
  0x28   :  { %273 = vmatpush.msra.mxu1 %v164_v54  ;;  %340 = vmatpush.msra.mxu2 %v129_v55  ;;  %v575_v21 = vld [vmem:[#allocation4 + $0x1b8] sm:$0xff]  ;;  %v98_v22 = vld [vmem:[%s1280_s0 + $0x20] sm:$0xff]  ;;  %v542_v24 = vld [vmem:[#allocation4 + $0xb0] sm:$0xff] }
  0x29   :  { %405 = vmatpush.msra.mxu3 %v161_v56  ;;  %210 = vmatpush.msra.mxu0 %v128_v57  ;;  %v574_v25 = vld [vmem:[#allocation4 + $0x1b0] sm:$0xff]  ;;  %v541_v26 = vld [vmem:[#allocation4 + $0xa8] sm:$0xff]  ;;  %v101_v29 = vld [vmem:[%s1280_s0 + $0x38] sm:$0xff] }
  0x2a   :  { %274 = vmatpush.msra.mxu1 %v162_v58  ;;  %341 = vmatpush.msra.mxu2 %v127_v59  ;;  %v573_v27 = vld [vmem:[#allocation4 + $0x1a8] sm:$0xff]  ;;  %v100_v28 = vld [vmem:[%s1280_s0 + $0x30] sm:$0xff]  ;;  %v540_v30 = vld [vmem:[#allocation4 + $0xa0] sm:$0xff] }
  0x2b   :  { %406 = vmatpush.msra.mxu3 %v159_v60  ;;  %342 = vmatmul.f32.vlgmr.msra.gmra.mxu2 %v94_v61  ;;  %v572_v31 = vld [vmem:[#allocation4 + $0x1a0] sm:$0xff]  ;;  %v539_v32 = vld [vmem:[#allocation4 + $0x98] sm:$0xff]  ;;  %v103_v35 = vld [vmem:[%s1280_s0 + $0x48] sm:$0xff] }
  0x2c   :  { %407 = vmatmul.f32.vlgmr.msra.gmra.mxu3 %v95_v62  ;;  %211 = vmatpush.msra.mxu0 %v126_v63  ;;  %v571_v33 = vld [vmem:[#allocation4 + $0x198] sm:$0xff]  ;;  %v102_v34 = vld [vmem:[%s1280_s0 + $0x40] sm:$0xff]  ;;  %v538_v36 = vld [vmem:[#allocation4 + $0x90] sm:$0xff] }
  0x2d   :  { %275 = vmatpush.msra.mxu1 %v160_v0  ;;  %212 = vmatmul.f32.vlgmr.msra.gmra.mxu0 %v94_v61  ;;  %v570_v37 = vld [vmem:[#allocation4 + $0x190] sm:$0xff]  ;;  %v537_v38 = vld [vmem:[#allocation4 + $0x88] sm:$0xff]  ;;  %v105_v41 = vld [vmem:[%s1280_s0 + $0x58] sm:$0xff] }
  0x2e   :  { %714 = vmatpush.msrb.mxu2 %v551_v1  ;;  %779 = vmatpush.msrb.mxu3 %v583_v3  ;;  %v569_v39 = vld [vmem:[#allocation4 + $0x188] sm:$0xff]  ;;  %v104_v40 = vld [vmem:[%s1280_s0 + $0x50] sm:$0xff]  ;;  %v536_v42 = vld [vmem:[#allocation4 + $0x80] sm:$0xff] }
  0x2f   :  { %276 = vmatpush.msra.mxu1 %v158_v2  ;;  %584 = vmatpush.msrb.mxu0 %v550_v4  ;;  %v568_v43 = vld [vmem:[#allocation4 + $0x180] sm:$0xff]  ;;  %v535_v44 = vld [vmem:[#allocation4 + $0x78] sm:$0xff]  ;;  %v107_v47 = vld [vmem:[%s1280_s0 + $0x68] sm:$0xff] }
  0x30   :  { %277 = vmatmul.f32.vlgmr.msra.gmra.mxu1 %v95_v62  ;;  %715 = vmatpush.msrb.mxu2 %v549_v6  ;;  %v567_v45 = vld [vmem:[#allocation4 + $0x178] sm:$0xff]  ;;  %v106_v46 = vld [vmem:[%s1280_s0 + $0x60] sm:$0xff]  ;;  %v534_v48 = vld [vmem:[#allocation4 + $0x70] sm:$0xff] }
  0x31   :  { %649 = vmatpush.msrb.mxu1 %v582_v5  ;;  %780 = vmatpush.msrb.mxu3 %v581_v7  ;;  %v566_v49 = vld [vmem:[#allocation4 + $0x170] sm:$0xff]  ;;  %v533_v50 = vld [vmem:[#allocation4 + $0x68] sm:$0xff]  ;;  %v109_v53 = vld [vmem:[%s1280_s0 + $0x78] sm:$0xff] }
  0x32   :  { %585 = vmatpush.msrb.mxu0 %v548_v8  ;;  %716 = vmatpush.msrb.mxu2 %v547_v10  ;;  %v565_v51 = vld [vmem:[#allocation4 + $0x168] sm:$0xff]  ;;  %v108_v52 = vld [vmem:[%s1280_s0 + $0x70] sm:$0xff]  ;;  %v532_v54 = vld [vmem:[#allocation4 + $0x60] sm:$0xff] }
  0x33   :  { %650 = vmatpush.msrb.mxu1 %v580_v9  ;;  %345 = vmatmul.f32.gmra.mxu2 %v96_v11  ;;  %v564_v55 = vld [vmem:[#allocation4 + $0x160] sm:$0xff]  ;;  %v531_v56 = vld [vmem:[#allocation4 + $0x58] sm:$0xff]  ;;  %v111_v59 = vld [vmem:[%s1280_s0 + $0x88] sm:$0xff] }
  0x34   :  { %410 = vmatmul.f32.gmra.mxu3 %v97_v12  ;;  %586 = vmatpush.msrb.mxu0 %v546_v14  ;;  %v563_v57 = vld [vmem:[#allocation4 + $0x158] sm:$0xff]  ;;  %v110_v58 = vld [vmem:[%s1280_s0 + $0x80] sm:$0xff]  ;;  %v530_v60 = vld [vmem:[#allocation4 + $0x50] sm:$0xff] }
  0x35   :  { %781 = vmatpush.msrb.mxu3 %v579_v13  ;;  %215 = vmatmul.f32.gmra.mxu0 %v96_v11  ;;  %v562_v61 = vld [vmem:[#allocation4 + $0x150] sm:$0xff]  ;;  %v529_v62 = vld [vmem:[#allocation4 + $0x48] sm:$0xff]  ;;  %v113_v1 = vld [vmem:[%s1280_s0 + $0x98] sm:$0xff] }
  0x36   :  { %651 = vmatpush.msrb.mxu1 %v578_v15  ;;  %717 = vmatpush.msrb.mxu2 %v545_v16  ;;  %v561_v63 = vld [vmem:[#allocation4 + $0x148] sm:$0xff]  ;;  %v112_v0 = vld [vmem:[%s1280_s0 + $0x90] sm:$0xff]  ;;  %v528_v2 = vld [vmem:[#allocation4 + $0x40] sm:$0xff] }
  0x37   :  { %782 = vmatpush.msrb.mxu3 %v577_v17  ;;  %587 = vmatpush.msrb.mxu0 %v544_v18  ;;  %v560_v3 = vld [vmem:[#allocation4 + $0x140] sm:$0xff]  ;;  %v527_v4 = vld [vmem:[#allocation4 + $0x38] sm:$0xff]  ;;  %v115_v7 = vld [vmem:[%s1280_s0 + $0xa8] sm:$0xff] }
  0x38   :  { %280 = vmatmul.f32.gmra.mxu1 %v97_v12  ;;  %718 = vmatpush.msrb.mxu2 %v543_v20  ;;  %v559_v5 = vld [vmem:[#allocation4 + $0x138] sm:$0xff]  ;;  %v114_v6 = vld [vmem:[%s1280_s0 + $0xa0] sm:$0xff]  ;;  %v526_v8 = vld [vmem:[#allocation4 + $0x30] sm:$0xff] }
  0x39   :  { %652 = vmatpush.msrb.mxu1 %v576_v19  ;;  %783 = vmatpush.msrb.mxu3 %v575_v21  ;;  %v558_v9 = vld [vmem:[#allocation4 + $0x130] sm:$0xff]  ;;  %v525_v10 = vld [vmem:[#allocation4 + $0x28] sm:$0xff]  ;;  %v117_v13 = vld [vmem:[%s1280_s0 + $0xb8] sm:$0xff] }
  0x3a   :  { %588 = vmatpush.msrb.mxu0 %v542_v24  ;;  %719 = vmatpush.msrb.mxu2 %v541_v26  ;;  %v557_v11 = vld [vmem:[#allocation4 + $0x128] sm:$0xff]  ;;  %v116_v12 = vld [vmem:[%s1280_s0 + $0xb0] sm:$0xff]  ;;  %v524_v14 = vld [vmem:[#allocation4 + $0x20] sm:$0xff] }
  0x3b   :  { %348 = vmatmul.f32.gmra.mxu2 %v98_v22  ;;  %653 = vmatpush.msrb.mxu1 %v574_v25  ;;  %v556_v15 = vld [vmem:[#allocation4 + $0x120] sm:$0xff]  ;;  %v523_v16 = vld [vmem:[#allocation4 + $0x18] sm:$0xff]  ;;  %v522_v18 = vld [vmem:[#allocation4 + $0x10] sm:$0xff] }
  0x3c   :  { %413 = vmatmul.f32.gmra.mxu3 %v99_v23  ;;  %589 = vmatpush.msrb.mxu0 %v540_v30  ;;  %v555_v17 = vld [vmem:[#allocation4 + $0x118] sm:$0xff]  ;;  %v554_v19 = vld [vmem:[#allocation4 + $0x110] sm:$0xff]  ;;  %v521_v20 = vld [vmem:[#allocation4 + $0x8] sm:$0xff] }
  0x3d   :  { %218 = vmatmul.f32.gmra.mxu0 %v98_v22  ;;  %784 = vmatpush.msrb.mxu3 %v573_v27  ;;  %v118_v21 = vld [vmem:[%s1280_s0 + $0xc0] sm:$0xff]  ;;  %v119_v22 = vld [vmem:[%s1280_s0 + $0xc8] sm:$0xff]  ;;  %v120_v24 = vld [vmem:[%s1280_s0 + $0xd0] sm:$0xff] }
  0x3e   :  { %654 = vmatpush.msrb.mxu1 %v572_v31  ;;  %720 = vmatpush.msrb.mxu2 %v539_v32  ;;  %v121_v25 = vld [vmem:[%s1280_s0 + $0xd8] sm:$0xff]  ;;  %v520_v26 = vld [vmem:[#allocation4] sm:$0xff]  ;;  %v124_v30 = vld [vmem:[%s1280_s0 + $0xf0] sm:$0xff] }
  0x3f   :  { %785 = vmatpush.msrb.mxu3 %v571_v33  ;;  %590 = vmatpush.msrb.mxu0 %v538_v36  ;;  %v552_v27 = vld [vmem:[#allocation4 + $0x100] sm:$0xff]  ;;  %v125_v31 = vld [vmem:[%s1280_s0 + $0xf8] sm:$0xff] }
  0x40   :  { %283 = vmatmul.f32.gmra.mxu1 %v99_v23  ;;  %721 = vmatpush.msrb.mxu2 %v537_v38  ;;  %v553_v23 = vld [vmem:[#allocation4 + $0x108] sm:$0xff]  ;;  %v190_v32 = vld [vmem:[%s1282_s2] sm:$0x3] }
  0x41   :  { %655 = vmatpush.msrb.mxu1 %v570_v37  ;;  %786 = vmatpush.msrb.mxu3 %v569_v39  ;;  %v1109_v33 = vperm.slane %v190_v32, 0  ;;  %v1112_v36 = vperm.slane %v190_v32, 1 }
  0x42   :  { %591 = vmatpush.msrb.mxu0 %v536_v42  ;;  %722 = vmatpush.msrb.mxu2 %v535_v44 }
  0x43   :  { %351 = vmatmul.f32.gmra.mxu2 %v100_v28  ;;  %656 = vmatpush.msrb.mxu1 %v568_v43 }
  0x44   :  { %416 = vmatmul.f32.gmra.mxu3 %v101_v29  ;;  %592 = vmatpush.msrb.mxu0 %v534_v48 }
  0x45   :  { %221 = vmatmul.f32.gmra.mxu0 %v100_v28  ;;  %787 = vmatpush.msrb.mxu3 %v567_v45  ;;  %v122_v28 = vld [vmem:[%s1280_s0 + $0xe0] sm:$0xff] }
  0x46   :  { %657 = vmatpush.msrb.mxu1 %v566_v49  ;;  %723 = vmatpush.msrb.mxu2 %v533_v50 }
  0x47   :  { %788 = vmatpush.msrb.mxu3 %v565_v51  ;;  %593 = vmatpush.msrb.mxu0 %v532_v54 }
  0x48   :  { %286 = vmatmul.f32.gmra.mxu1 %v101_v29  ;;  %724 = vmatpush.msrb.mxu2 %v531_v56  ;;  %v123_v29 = vld [vmem:[%s1280_s0 + $0xe8] sm:$0xff] }
  0x49   :  { %658 = vmatpush.msrb.mxu1 %v564_v55  ;;  %789 = vmatpush.msrb.mxu3 %v563_v57 }
  0x4a   :  { %594 = vmatpush.msrb.mxu0 %v530_v60  ;;  %725 = vmatpush.msrb.mxu2 %v529_v62 }
  0x4b   :  { %354 = vmatmul.f32.gmra.mxu2 %v102_v34  ;;  %659 = vmatpush.msrb.mxu1 %v562_v61 }
  0x4c   :  { %419 = vmatmul.f32.gmra.mxu3 %v103_v35  ;;  %595 = vmatpush.msrb.mxu0 %v528_v2 }
  0x4d   :  { %224 = vmatmul.f32.gmra.mxu0 %v102_v34  ;;  %790 = vmatpush.msrb.mxu3 %v561_v63 }
  0x4e   :  { %660 = vmatpush.msrb.mxu1 %v560_v3  ;;  %726 = vmatpush.msrb.mxu2 %v527_v4 }
  0x4f   :  { %791 = vmatpush.msrb.mxu3 %v559_v5  ;;  %596 = vmatpush.msrb.mxu0 %v526_v8 }
  0x50   :  { %289 = vmatmul.f32.gmra.mxu1 %v103_v35  ;;  %727 = vmatpush.msrb.mxu2 %v525_v10 }
  0x51   :  { %661 = vmatpush.msrb.mxu1 %v558_v9  ;;  %792 = vmatpush.msrb.mxu3 %v557_v11 }
  0x52   :  { %597 = vmatpush.msrb.mxu0 %v524_v14  ;;  %728 = vmatpush.msrb.mxu2 %v523_v16 }
  0x53   :  { %357 = vmatmul.f32.gmra.mxu2 %v104_v40  ;;  %662 = vmatpush.msrb.mxu1 %v556_v15 }
  0x54   :  { %422 = vmatmul.f32.gmra.mxu3 %v105_v41  ;;  %598 = vmatpush.msrb.mxu0 %v522_v18 }
  0x55   :  { %227 = vmatmul.f32.gmra.mxu0 %v104_v40  ;;  %793 = vmatpush.msrb.mxu3 %v555_v17 }
  0x56   :  { %663 = vmatpush.msrb.mxu1 %v554_v19  ;;  %729 = vmatpush.msrb.mxu2 %v521_v20 }
  0x57   :  { %794 = vmatpush.msrb.mxu3 %v553_v23  ;;  %599 = vmatpush.msrb.mxu0 %v520_v26 }
  0x58   :  { %292 = vmatmul.f32.gmra.mxu1 %v105_v41 }
  0x59   :  { %664 = vmatpush.msrb.mxu1 %v552_v27 }
  0x5b   :  { %360 = vmatmul.f32.gmra.mxu2 %v106_v46 }
  0x5c   :  { %425 = vmatmul.f32.gmra.mxu3 %v107_v47 }
  0x5d   :  { %230 = vmatmul.f32.gmra.mxu0 %v106_v46 }
  0x60   :  { %295 = vmatmul.f32.gmra.mxu1 %v107_v47 }
  0x63   :  { %363 = vmatmul.f32.gmra.mxu2 %v108_v52 }
  0x64   :  { %428 = vmatmul.f32.gmra.mxu3 %v109_v53 }
  0x65   :  { %233 = vmatmul.f32.gmra.mxu0 %v108_v52 }
  0x68   :  { %298 = vmatmul.f32.gmra.mxu1 %v109_v53 }
  0x6b   :  { %366 = vmatmul.f32.gmra.mxu2 %v110_v58 }
  0x6c   :  { %431 = vmatmul.f32.gmra.mxu3 %v111_v59 }
  0x6d   :  { %236 = vmatmul.f32.gmra.mxu0 %v110_v58 }
  0x70   :  { %301 = vmatmul.f32.gmra.mxu1 %v111_v59 }
  0x73   :  { %369 = vmatmul.f32.gmra.mxu2 %v112_v0 }
  0x74   :  { %434 = vmatmul.f32.gmra.mxu3 %v113_v1 }
  0x75   :  { %239 = vmatmul.f32.gmra.mxu0 %v112_v0 }
  0x78   :  { %304 = vmatmul.f32.gmra.mxu1 %v113_v1 }
  0x7b   :  { %372 = vmatmul.f32.gmra.mxu2 %v114_v6 }
  0x7c   :  { %437 = vmatmul.f32.gmra.mxu3 %v115_v7 }
  0x7d   :  { %242 = vmatmul.f32.gmra.mxu0 %v114_v6 }
  0x80   :  { %307 = vmatmul.f32.gmra.mxu1 %v115_v7 }
  0x83   :  { %375 = vmatmul.f32.gmra.mxu2 %v116_v12 }
  0x84   :  { %440 = vmatmul.f32.gmra.mxu3 %v117_v13 }
  0x85   :  { %245 = vmatmul.f32.gmra.mxu0 %v116_v12 }
  0x88   :  { %310 = vmatmul.f32.gmra.mxu1 %v117_v13 }
  0x8b   :  { %378 = vmatmul.f32.gmra.mxu2 %v118_v21 }
  0x8c   :  { %443 = vmatmul.f32.gmra.mxu3 %v119_v22 }
  0x8d   :  { %248 = vmatmul.f32.gmra.mxu0 %v118_v21 }
  0x90   :  { %313 = vmatmul.f32.gmra.mxu1 %v119_v22 }
  0x93   :  { %381 = vmatmul.f32.gmra.mxu2 %v120_v24 }
  0x94   :  { %446 = vmatmul.f32.gmra.mxu3 %v121_v25 }
  0x95   :  { %251 = vmatmul.f32.gmra.mxu0 %v120_v24 }
  0x98   :  { %316 = vmatmul.f32.gmra.mxu1 %v121_v25 }
  0x9b   :  { %384 = vmatmul.f32.gmra.mxu2 %v122_v28 }
  0x9c   :  { %449 = vmatmul.f32.gmra.mxu3 %v123_v29 }
  0x9d   :  { %254 = vmatmul.f32.gmra.mxu0 %v122_v28 }
  0xa0   :  { %319 = vmatmul.f32.gmra.mxu1 %v123_v29 }
  0xa3   :  { %387 = vmatmul.f32.gmra.mxu2 %v124_v30 }
  0xa4   :  { %452 = vmatmul.f32.gmra.mxu3 %v125_v31 }
  0xa5   :  { %257 = vmatmul.f32.gmra.mxu0 %v124_v30 }
  0xa8   :  { %322 = vmatmul.f32.gmra.mxu1 %v125_v31 }
  0xaa   :  { %v213_v34 = vpop.f32.mrf.mxu0 }
  0xab   :  { %v214_v35 = vadd.f32 %v213_v34, %v1109_v33 }
  0xad   :  { %v278_v37 = vpop.f32.mrf.mxu1 }
  0xae   :  { %v279_v38 = vadd.f32 %v278_v37, %v214_v35  ;;  %v343_v39 = vpop.f32.mrf.mxu2 }
  0xaf   :  { %v408_v40 = vpop.f32.mrf.mxu3  ;;  %v344_v41 = vadd.f32 %v343_v39, %v1112_v36 }
  0xb0   :  { %v456_v42 = vmax.f32 %v279_v38, 0.0 }
  0xb1   :  { %v409_v43 = vadd.f32 %v408_v40, %v344_v41 }
  0xb2   :  { %600 = vmatmul.f32.vlgmr.msrb.gmra.mxu0 %v456_v42  ;;  %730 = vmatmul.f32.vlgmr.msrb.gmra.mxu2 %v456_v42  ;;  %v216_v44 = vpop.f32.mrf.mxu0 }
  0xb3   :  { %v457_v45 = vmax.f32 %v409_v43, 0.0  ;;  %v217_v46 = vadd.f32 %v216_v44, %v1109_v33 }
  0xb5   :  { %v281_v47 = vpop.f32.mrf.mxu1  ;;  %665 = vmatmul.f32.vlgmr.msrb.gmra.mxu1 %v457_v45  ;;  %795 = vmatmul.f32.vlgmr.msrb.gmra.mxu3 %v457_v45 }
  0xb6   :  { %v282_v48 = vadd.f32 %v281_v47, %v217_v46  ;;  %v346_v49 = vpop.f32.mrf.mxu2 }
  0xb7   :  { %v411_v50 = vpop.f32.mrf.mxu3  ;;  %v347_v51 = vadd.f32 %v346_v49, %v1112_v36 }
  0xb8   :  { %v458_v52 = vmax.f32 %v282_v48, 0.0 }
  0xb9   :  { %v412_v53 = vadd.f32 %v411_v50, %v347_v51 }
  0xba   :  { %603 = vmatmul.f32.gmra.mxu0 %v458_v52  ;;  %733 = vmatmul.f32.gmra.mxu2 %v458_v52  ;;  %v219_v54 = vpop.f32.mrf.mxu0 }
  0xbb   :  { %v459_v55 = vmax.f32 %v412_v53, 0.0  ;;  %v220_v56 = vadd.f32 %v219_v54, %v1109_v33 }
  0xbd   :  { %v284_v57 = vpop.f32.mrf.mxu1  ;;  %668 = vmatmul.f32.gmra.mxu1 %v459_v55  ;;  %798 = vmatmul.f32.gmra.mxu3 %v459_v55 }
  0xbe   :  { %v285_v58 = vadd.f32 %v284_v57, %v220_v56  ;;  %v349_v59 = vpop.f32.mrf.mxu2 }
  0xbf   :  { %v414_v60 = vpop.f32.mrf.mxu3  ;;  %v350_v61 = vadd.f32 %v349_v59, %v1112_v36 }
  0xc0   :  { %v460_v62 = vmax.f32 %v285_v58, 0.0 }
  0xc1   :  { %v415_v63 = vadd.f32 %v414_v60, %v350_v61 }
  0xc2   :  { %606 = vmatmul.f32.gmra.mxu0 %v460_v62  ;;  %736 = vmatmul.f32.gmra.mxu2 %v460_v62  ;;  %v222_v0 = vpop.f32.mrf.mxu0 }
  0xc3   :  { %v461_v1 = vmax.f32 %v415_v63, 0.0  ;;  %v223_v2 = vadd.f32 %v222_v0, %v1109_v33 }
  0xc5   :  { %v287_v3 = vpop.f32.mrf.mxu1  ;;  %671 = vmatmul.f32.gmra.mxu1 %v461_v1  ;;  %801 = vmatmul.f32.gmra.mxu3 %v461_v1 }
  0xc6   :  { %v288_v4 = vadd.f32 %v287_v3, %v223_v2  ;;  %v352_v5 = vpop.f32.mrf.mxu2 }
  0xc7   :  { %v417_v6 = vpop.f32.mrf.mxu3  ;;  %v353_v7 = vadd.f32 %v352_v5, %v1112_v36 }
  0xc8   :  { %v462_v8 = vmax.f32 %v288_v4, 0.0 }
  0xc9   :  { %v418_v9 = vadd.f32 %v417_v6, %v353_v7 }
  0xca   :  { %609 = vmatmul.f32.gmra.mxu0 %v462_v8  ;;  %739 = vmatmul.f32.gmra.mxu2 %v462_v8  ;;  %v225_v10 = vpop.f32.mrf.mxu0 }
  0xcb   :  { %v463_v11 = vmax.f32 %v418_v9, 0.0  ;;  %v226_v12 = vadd.f32 %v225_v10, %v1109_v33 }
  0xcd   :  { %v290_v13 = vpop.f32.mrf.mxu1  ;;  %674 = vmatmul.f32.gmra.mxu1 %v463_v11  ;;  %804 = vmatmul.f32.gmra.mxu3 %v463_v11 }
  0xce   :  { %v291_v14 = vadd.f32 %v290_v13, %v226_v12  ;;  %v355_v15 = vpop.f32.mrf.mxu2 }
  0xcf   :  { %v420_v16 = vpop.f32.mrf.mxu3  ;;  %v356_v17 = vadd.f32 %v355_v15, %v1112_v36 }
  0xd0   :  { %v464_v18 = vmax.f32 %v291_v14, 0.0 }
  0xd1   :  { %v421_v19 = vadd.f32 %v420_v16, %v356_v17 }
  0xd2   :  { %612 = vmatmul.f32.gmra.mxu0 %v464_v18  ;;  %742 = vmatmul.f32.gmra.mxu2 %v464_v18  ;;  %v228_v20 = vpop.f32.mrf.mxu0 }
  0xd3   :  { %v465_v21 = vmax.f32 %v421_v19, 0.0  ;;  %v229_v22 = vadd.f32 %v228_v20, %v1109_v33 }
  0xd5   :  { %v293_v23 = vpop.f32.mrf.mxu1  ;;  %677 = vmatmul.f32.gmra.mxu1 %v465_v21  ;;  %807 = vmatmul.f32.gmra.mxu3 %v465_v21 }
  0xd6   :  { %v294_v24 = vadd.f32 %v293_v23, %v229_v22  ;;  %v358_v25 = vpop.f32.mrf.mxu2 }
  0xd7   :  { %v423_v26 = vpop.f32.mrf.mxu3  ;;  %v359_v27 = vadd.f32 %v358_v25, %v1112_v36 }
  0xd8   :  { %v466_v28 = vmax.f32 %v294_v24, 0.0 }
  0xd9   :  { %v424_v29 = vadd.f32 %v423_v26, %v359_v27 }
  0xda   :  { %615 = vmatmul.f32.gmra.mxu0 %v466_v28  ;;  %745 = vmatmul.f32.gmra.mxu2 %v466_v28  ;;  %v231_v30 = vpop.f32.mrf.mxu0 }
  0xdb   :  { %v467_v31 = vmax.f32 %v424_v29, 0.0  ;;  %v232_v32 = vadd.f32 %v231_v30, %v1109_v33 }
  0xdd   :  { %v296_v34 = vpop.f32.mrf.mxu1  ;;  %680 = vmatmul.f32.gmra.mxu1 %v467_v31  ;;  %810 = vmatmul.f32.gmra.mxu3 %v467_v31 }
  0xde   :  { %v297_v35 = vadd.f32 %v296_v34, %v232_v32  ;;  %v361_v37 = vpop.f32.mrf.mxu2 }
  0xdf   :  { %v426_v38 = vpop.f32.mrf.mxu3  ;;  %v362_v39 = vadd.f32 %v361_v37, %v1112_v36 }
  0xe0   :  { %v468_v40 = vmax.f32 %v297_v35, 0.0 }
  0xe1   :  { %v427_v41 = vadd.f32 %v426_v38, %v362_v39 }
  0xe2   :  { %618 = vmatmul.f32.gmra.mxu0 %v468_v40  ;;  %748 = vmatmul.f32.gmra.mxu2 %v468_v40  ;;  %v234_v42 = vpop.f32.mrf.mxu0 }
  0xe3   :  { %v469_v43 = vmax.f32 %v427_v41, 0.0  ;;  %v235_v44 = vadd.f32 %v234_v42, %v1109_v33 }
  0xe5   :  { %v299_v45 = vpop.f32.mrf.mxu1  ;;  %683 = vmatmul.f32.gmra.mxu1 %v469_v43  ;;  %813 = vmatmul.f32.gmra.mxu3 %v469_v43 }
  0xe6   :  { %v300_v46 = vadd.f32 %v299_v45, %v235_v44  ;;  %v364_v47 = vpop.f32.mrf.mxu2 }
  0xe7   :  { %v429_v48 = vpop.f32.mrf.mxu3  ;;  %v365_v49 = vadd.f32 %v364_v47, %v1112_v36 }
  0xe8   :  { %v470_v50 = vmax.f32 %v300_v46, 0.0 }
  0xe9   :  { %v430_v51 = vadd.f32 %v429_v48, %v365_v49 }
  0xea   :  { %621 = vmatmul.f32.gmra.mxu0 %v470_v50  ;;  %751 = vmatmul.f32.gmra.mxu2 %v470_v50  ;;  %v237_v52 = vpop.f32.mrf.mxu0 }
  0xeb   :  { %v471_v53 = vmax.f32 %v430_v51, 0.0  ;;  %v238_v54 = vadd.f32 %v237_v52, %v1109_v33 }
  0xed   :  { %v302_v55 = vpop.f32.mrf.mxu1  ;;  %686 = vmatmul.f32.gmra.mxu1 %v471_v53  ;;  %816 = vmatmul.f32.gmra.mxu3 %v471_v53 }
  0xee   :  { %v303_v56 = vadd.f32 %v302_v55, %v238_v54  ;;  %v367_v57 = vpop.f32.mrf.mxu2 }
  0xef   :  { %v432_v58 = vpop.f32.mrf.mxu3  ;;  %v368_v59 = vadd.f32 %v367_v57, %v1112_v36 }
  0xf0   :  { %v472_v60 = vmax.f32 %v303_v56, 0.0 }
  0xf1   :  { %v433_v61 = vadd.f32 %v432_v58, %v368_v59 }
  0xf2   :  { %624 = vmatmul.f32.gmra.mxu0 %v472_v60  ;;  %754 = vmatmul.f32.gmra.mxu2 %v472_v60  ;;  %v240_v62 = vpop.f32.mrf.mxu0 }
  0xf3   :  { %v473_v63 = vmax.f32 %v433_v61, 0.0  ;;  %v241_v0 = vadd.f32 %v240_v62, %v1109_v33 }
  0xf5   :  { %v305_v1 = vpop.f32.mrf.mxu1  ;;  %689 = vmatmul.f32.gmra.mxu1 %v473_v63  ;;  %819 = vmatmul.f32.gmra.mxu3 %v473_v63 }
  0xf6   :  { %v306_v2 = vadd.f32 %v305_v1, %v241_v0  ;;  %v370_v3 = vpop.f32.mrf.mxu2 }
  0xf7   :  { %v435_v4 = vpop.f32.mrf.mxu3  ;;  %v371_v5 = vadd.f32 %v370_v3, %v1112_v36 }
  0xf8   :  { %v474_v6 = vmax.f32 %v306_v2, 0.0 }
  0xf9   :  { %v436_v7 = vadd.f32 %v435_v4, %v371_v5 }
  0xfa   :  { %627 = vmatmul.f32.gmra.mxu0 %v474_v6  ;;  %757 = vmatmul.f32.gmra.mxu2 %v474_v6  ;;  %v243_v8 = vpop.f32.mrf.mxu0 }
  0xfb   :  { %v475_v9 = vmax.f32 %v436_v7, 0.0  ;;  %v244_v10 = vadd.f32 %v243_v8, %v1109_v33 }
  0xfd   :  { %v308_v11 = vpop.f32.mrf.mxu1  ;;  %692 = vmatmul.f32.gmra.mxu1 %v475_v9  ;;  %822 = vmatmul.f32.gmra.mxu3 %v475_v9 }
  0xfe   :  { %v309_v12 = vadd.f32 %v308_v11, %v244_v10  ;;  %v373_v13 = vpop.f32.mrf.mxu2 }
  0xff   :  { %v438_v14 = vpop.f32.mrf.mxu3  ;;  %v374_v15 = vadd.f32 %v373_v13, %v1112_v36 }
 0x100   :  { %v476_v16 = vmax.f32 %v309_v12, 0.0 }
 0x101   :  { %v439_v17 = vadd.f32 %v438_v14, %v374_v15 }
 0x102   :  { %630 = vmatmul.f32.gmra.mxu0 %v476_v16  ;;  %760 = vmatmul.f32.gmra.mxu2 %v476_v16  ;;  %v246_v18 = vpop.f32.mrf.mxu0 }
 0x103   :  { %v477_v19 = vmax.f32 %v439_v17, 0.0  ;;  %v247_v20 = vadd.f32 %v246_v18, %v1109_v33 }
 0x105   :  { %v311_v21 = vpop.f32.mrf.mxu1  ;;  %695 = vmatmul.f32.gmra.mxu1 %v477_v19  ;;  %825 = vmatmul.f32.gmra.mxu3 %v477_v19 }
 0x106   :  { %v312_v22 = vadd.f32 %v311_v21, %v247_v20  ;;  %v376_v23 = vpop.f32.mrf.mxu2 }
 0x107   :  { %v441_v24 = vpop.f32.mrf.mxu3  ;;  %v377_v25 = vadd.f32 %v376_v23, %v1112_v36 }
 0x108   :  { %v478_v26 = vmax.f32 %v312_v22, 0.0 }
 0x109   :  { %v442_v27 = vadd.f32 %v441_v24, %v377_v25 }
 0x10a   :  { %633 = vmatmul.f32.gmra.mxu0 %v478_v26  ;;  %763 = vmatmul.f32.gmra.mxu2 %v478_v26  ;;  %v249_v28 = vpop.f32.mrf.mxu0 }
 0x10b   :  { %v479_v29 = vmax.f32 %v442_v27, 0.0  ;;  %v250_v30 = vadd.f32 %v249_v28, %v1109_v33 }
 0x10d   :  { %v314_v31 = vpop.f32.mrf.mxu1  ;;  %698 = vmatmul.f32.gmra.mxu1 %v479_v29  ;;  %828 = vmatmul.f32.gmra.mxu3 %v479_v29 }
 0x10e   :  { %v315_v32 = vadd.f32 %v314_v31, %v250_v30  ;;  %v379_v34 = vpop.f32.mrf.mxu2 }
 0x10f   :  { %v444_v35 = vpop.f32.mrf.mxu3  ;;  %v380_v37 = vadd.f32 %v379_v34, %v1112_v36 }
 0x110   :  { %v480_v38 = vmax.f32 %v315_v32, 0.0 }
 0x111   :  { %v445_v39 = vadd.f32 %v444_v35, %v380_v37 }
 0x112   :  { %636 = vmatmul.f32.gmra.mxu0 %v480_v38  ;;  %766 = vmatmul.f32.gmra.mxu2 %v480_v38  ;;  %v252_v40 = vpop.f32.mrf.mxu0 }
 0x113   :  { %v481_v41 = vmax.f32 %v445_v39, 0.0  ;;  %v253_v42 = vadd.f32 %v252_v40, %v1109_v33 }
 0x115   :  { %v317_v43 = vpop.f32.mrf.mxu1  ;;  %701 = vmatmul.f32.gmra.mxu1 %v481_v41  ;;  %831 = vmatmul.f32.gmra.mxu3 %v481_v41 }
 0x116   :  { %v318_v44 = vadd.f32 %v317_v43, %v253_v42  ;;  %v382_v45 = vpop.f32.mrf.mxu2 }
 0x117   :  { %v447_v46 = vpop.f32.mrf.mxu3  ;;  %v383_v47 = vadd.f32 %v382_v45, %v1112_v36 }
 0x118   :  { %v482_v48 = vmax.f32 %v318_v44, 0.0 }
 0x119   :  { %v448_v49 = vadd.f32 %v447_v46, %v383_v47 }
 0x11a   :  { %639 = vmatmul.f32.gmra.mxu0 %v482_v48  ;;  %769 = vmatmul.f32.gmra.mxu2 %v482_v48  ;;  %v255_v50 = vpop.f32.mrf.mxu0 }
 0x11b   :  { %v483_v51 = vmax.f32 %v448_v49, 0.0  ;;  %v256_v52 = vadd.f32 %v255_v50, %v1109_v33 }
 0x11d   :  { %v320_v53 = vpop.f32.mrf.mxu1  ;;  %704 = vmatmul.f32.gmra.mxu1 %v483_v51  ;;  %834 = vmatmul.f32.gmra.mxu3 %v483_v51 }
 0x11e   :  { %v321_v54 = vadd.f32 %v320_v53, %v256_v52  ;;  %v385_v55 = vpop.f32.mrf.mxu2 }
 0x11f   :  { %v450_v56 = vpop.f32.mrf.mxu3  ;;  %v386_v57 = vadd.f32 %v385_v55, %v1112_v36 }
 0x120   :  { %v484_v58 = vmax.f32 %v321_v54, 0.0 }
 0x121   :  { %v451_v59 = vadd.f32 %v450_v56, %v386_v57 }
 0x122   :  { %642 = vmatmul.f32.gmra.mxu0 %v484_v58  ;;  %772 = vmatmul.f32.gmra.mxu2 %v484_v58  ;;  %v258_v60 = vpop.f32.mrf.mxu0 }
 0x123   :  { %v485_v61 = vmax.f32 %v451_v59, 0.0  ;;  %v259_v62 = vadd.f32 %v258_v60, %v1109_v33  ;;  %v56_v33 = vld [vmem:[%s1284_s4] sm:$0x3] }
 0x124   :  { %v1148_v8 = vperm.slane %v56_v33, 0  ;;  %v1154_v13 = vperm.slane %v56_v33, 1 }
 0x125   :  { %v323_v63 = vpop.f32.mrf.mxu1  ;;  %707 = vmatmul.f32.gmra.mxu1 %v485_v61  ;;  %837 = vmatmul.f32.gmra.mxu3 %v485_v61 }
 0x126   :  { %v324_v0 = vadd.f32 %v323_v63, %v259_v62  ;;  %v388_v1 = vpop.f32.mrf.mxu2 }
 0x127   :  { %v453_v2 = vpop.f32.mrf.mxu3  ;;  %v389_v3 = vadd.f32 %v388_v1, %v1112_v36 }
 0x128   :  { %v486_v4 = vmax.f32 %v324_v0, 0.0 }
 0x129   :  { %v454_v5 = vadd.f32 %v453_v2, %v389_v3 }
 0x12a   :  { %645 = vmatmul.f32.gmra.mxu0 %v486_v4  ;;  %775 = vmatmul.f32.gmra.mxu2 %v486_v4 }
 0x12b   :  { %v487_v6 = vmax.f32 %v454_v5, 0.0 }
 0x12d   :  { %710 = vmatmul.f32.gmra.mxu1 %v487_v6  ;;  %840 = vmatmul.f32.gmra.mxu3 %v487_v6 }
 0x12f   :  { %v601_v7 = vpop.f32.mrf.mxu0 }
 0x132   :  { %v666_v9 = vpop.f32.mrf.mxu1 }
 0x133   :  { %v667_v10 = vadd.f32 %v666_v9, %v601_v7 }
 0x135   :  { %v731_v11 = vpop.f32.mrf.mxu2  ;;  %v844_v12 = vadd.f32 %v667_v10, %v1148_v8 }
 0x137   :  { %v604_v36 = vpop.f32.mrf.mxu0  ;;  %876 = vst [vmem:[%s1285_s5] sm:$0xff] %v844_v12 }
 0x138   :  { %v796_v14 = vpop.f32.mrf.mxu3 }
 0x139   :  { %v797_v15 = vadd.f32 %v796_v14, %v731_v11 }
 0x13a   :  { %v669_v16 = vpop.f32.mrf.mxu1 }
 0x13b   :  { %v845_v17 = vadd.f32 %v797_v15, %v1154_v13  ;;  %v670_v18 = vadd.f32 %v669_v16, %v604_v36 }
 0x13d   :  { %v734_v19 = vpop.f32.mrf.mxu2  ;;  %877 = vst [vmem:[%s1285_s5 + $0x8] sm:$0xff] %v845_v17  ;;  %v846_v20 = vadd.f32 %v670_v18, %v1148_v8 }
 0x13f   :  { %v607_v21 = vpop.f32.mrf.mxu0  ;;  %878 = vst [vmem:[%s1285_s5 + $0x10] sm:$0xff] %v846_v20 }
 0x140   :  { %v799_v22 = vpop.f32.mrf.mxu3 }
 0x141   :  { %v800_v23 = vadd.f32 %v799_v22, %v734_v19 }
 0x142   :  { %v672_v24 = vpop.f32.mrf.mxu1 }
 0x143   :  { %v847_v25 = vadd.f32 %v800_v23, %v1154_v13  ;;  %v673_v26 = vadd.f32 %v672_v24, %v607_v21 }
 0x145   :  { %v737_v27 = vpop.f32.mrf.mxu2  ;;  %879 = vst [vmem:[%s1285_s5 + $0x18] sm:$0xff] %v847_v25  ;;  %v848_v28 = vadd.f32 %v673_v26, %v1148_v8 }
 0x147   :  { %v610_v29 = vpop.f32.mrf.mxu0  ;;  %880 = vst [vmem:[%s1285_s5 + $0x20] sm:$0xff] %v848_v28 }
 0x148   :  { %v802_v30 = vpop.f32.mrf.mxu3 }
 0x149   :  { %v803_v31 = vadd.f32 %v802_v30, %v737_v27 }
 0x14a   :  { %v675_v32 = vpop.f32.mrf.mxu1 }
 0x14b   :  { %v849_v34 = vadd.f32 %v803_v31, %v1154_v13  ;;  %v676_v35 = vadd.f32 %v675_v32, %v610_v29 }
 0x14d   :  { %v740_v37 = vpop.f32.mrf.mxu2  ;;  %881 = vst [vmem:[%s1285_s5 + $0x28] sm:$0xff] %v849_v34  ;;  %v850_v38 = vadd.f32 %v676_v35, %v1148_v8 }
 0x14f   :  { %v613_v39 = vpop.f32.mrf.mxu0  ;;  %882 = vst [vmem:[%s1285_s5 + $0x30] sm:$0xff] %v850_v38 }
 0x150   :  { %v805_v40 = vpop.f32.mrf.mxu3 }
 0x151   :  { %v806_v41 = vadd.f32 %v805_v40, %v740_v37 }
 0x152   :  { %v678_v42 = vpop.f32.mrf.mxu1 }
 0x153   :  { %v851_v43 = vadd.f32 %v806_v41, %v1154_v13  ;;  %v679_v44 = vadd.f32 %v678_v42, %v613_v39 }
 0x155   :  { %v743_v45 = vpop.f32.mrf.mxu2  ;;  %883 = vst [vmem:[%s1285_s5 + $0x38] sm:$0xff] %v851_v43  ;;  %v852_v46 = vadd.f32 %v679_v44, %v1148_v8 }
 0x157   :  { %v616_v47 = vpop.f32.mrf.mxu0  ;;  %884 = vst [vmem:[%s1285_s5 + $0x40] sm:$0xff] %v852_v46 }
 0x158   :  { %v808_v48 = vpop.f32.mrf.mxu3 }
 0x159   :  { %v809_v49 = vadd.f32 %v808_v48, %v743_v45 }
 0x15a   :  { %v681_v50 = vpop.f32.mrf.mxu1 }
 0x15b   :  { %v853_v51 = vadd.f32 %v809_v49, %v1154_v13  ;;  %v682_v52 = vadd.f32 %v681_v50, %v616_v47 }
 0x15d   :  { %v746_v53 = vpop.f32.mrf.mxu2  ;;  %885 = vst [vmem:[%s1285_s5 + $0x48] sm:$0xff] %v853_v51  ;;  %v854_v54 = vadd.f32 %v682_v52, %v1148_v8 }
 0x15f   :  { %v619_v55 = vpop.f32.mrf.mxu0  ;;  %886 = vst [vmem:[%s1285_s5 + $0x50] sm:$0xff] %v854_v54 }
 0x160   :  { %v811_v56 = vpop.f32.mrf.mxu3 }
 0x161   :  { %v812_v57 = vadd.f32 %v811_v56, %v746_v53 }
 0x162   :  { %v684_v58 = vpop.f32.mrf.mxu1 }
 0x163   :  { %v855_v59 = vadd.f32 %v812_v57, %v1154_v13  ;;  %v685_v60 = vadd.f32 %v684_v58, %v619_v55 }
 0x165   :  { %v749_v61 = vpop.f32.mrf.mxu2  ;;  %887 = vst [vmem:[%s1285_s5 + $0x58] sm:$0xff] %v855_v59  ;;  %v856_v62 = vadd.f32 %v685_v60, %v1148_v8 }
 0x167   :  { %v622_v63 = vpop.f32.mrf.mxu0  ;;  %888 = vst [vmem:[%s1285_s5 + $0x60] sm:$0xff] %v856_v62 }
 0x168   :  { %v814_v0 = vpop.f32.mrf.mxu3 }
 0x169   :  { %v815_v1 = vadd.f32 %v814_v0, %v749_v61 }
 0x16a   :  { %v687_v2 = vpop.f32.mrf.mxu1 }
 0x16b   :  { %v857_v3 = vadd.f32 %v815_v1, %v1154_v13  ;;  %v688_v4 = vadd.f32 %v687_v2, %v622_v63 }
 0x16d   :  { %v752_v5 = vpop.f32.mrf.mxu2  ;;  %889 = vst [vmem:[%s1285_s5 + $0x68] sm:$0xff] %v857_v3  ;;  %v858_v6 = vadd.f32 %v688_v4, %v1148_v8 }
 0x16f   :  { %v625_v7 = vpop.f32.mrf.mxu0  ;;  %890 = vst [vmem:[%s1285_s5 + $0x70] sm:$0xff] %v858_v6 }
 0x170   :  { %v817_v33 = vpop.f32.mrf.mxu3 }
 0x171   :  { %v818_v9 = vadd.f32 %v817_v33, %v752_v5 }
 0x172   :  { %v690_v10 = vpop.f32.mrf.mxu1 }
 0x173   :  { %v859_v11 = vadd.f32 %v818_v9, %v1154_v13  ;;  %v691_v12 = vadd.f32 %v690_v10, %v625_v7 }
 0x175   :  { %v755_v36 = vpop.f32.mrf.mxu2  ;;  %891 = vst [vmem:[%s1285_s5 + $0x78] sm:$0xff] %v859_v11  ;;  %v860_v14 = vadd.f32 %v691_v12, %v1148_v8 }
 0x177   :  { %v628_v15 = vpop.f32.mrf.mxu0  ;;  %892 = vst [vmem:[%s1285_s5 + $0x80] sm:$0xff] %v860_v14 }
 0x178   :  { %v820_v16 = vpop.f32.mrf.mxu3 }
 0x179   :  { %v821_v17 = vadd.f32 %v820_v16, %v755_v36 }
 0x17a   :  { %v693_v18 = vpop.f32.mrf.mxu1 }
 0x17b   :  { %v861_v19 = vadd.f32 %v821_v17, %v1154_v13  ;;  %v694_v20 = vadd.f32 %v693_v18, %v628_v15 }
 0x17d   :  { %v758_v21 = vpop.f32.mrf.mxu2  ;;  %893 = vst [vmem:[%s1285_s5 + $0x88] sm:$0xff] %v861_v19  ;;  %v862_v22 = vadd.f32 %v694_v20, %v1148_v8 }
 0x17f   :  { %v631_v23 = vpop.f32.mrf.mxu0  ;;  %894 = vst [vmem:[%s1285_s5 + $0x90] sm:$0xff] %v862_v22 }
 0x180   :  { %v823_v24 = vpop.f32.mrf.mxu3 }
 0x181   :  { %v824_v25 = vadd.f32 %v823_v24, %v758_v21 }
 0x182   :  { %v696_v26 = vpop.f32.mrf.mxu1 }
 0x183   :  { %v863_v27 = vadd.f32 %v824_v25, %v1154_v13  ;;  %v697_v28 = vadd.f32 %v696_v26, %v631_v23 }
 0x185   :  { %v761_v29 = vpop.f32.mrf.mxu2  ;;  %895 = vst [vmem:[%s1285_s5 + $0x98] sm:$0xff] %v863_v27  ;;  %v864_v30 = vadd.f32 %v697_v28, %v1148_v8 }
 0x187   :  { %v634_v31 = vpop.f32.mrf.mxu0  ;;  %896 = vst [vmem:[%s1285_s5 + $0xa0] sm:$0xff] %v864_v30 }
 0x188   :  { %v826_v32 = vpop.f32.mrf.mxu3 }
 0x189   :  { %v827_v34 = vadd.f32 %v826_v32, %v761_v29 }
 0x18a   :  { %v699_v35 = vpop.f32.mrf.mxu1 }
 0x18b   :  { %v865_v37 = vadd.f32 %v827_v34, %v1154_v13  ;;  %v700_v38 = vadd.f32 %v699_v35, %v634_v31 }
 0x18d   :  { %v764_v39 = vpop.f32.mrf.mxu2  ;;  %897 = vst [vmem:[%s1285_s5 + $0xa8] sm:$0xff] %v865_v37  ;;  %v866_v40 = vadd.f32 %v700_v38, %v1148_v8 }
 0x18f   :  { %v637_v41 = vpop.f32.mrf.mxu0  ;;  %898 = vst [vmem:[%s1285_s5 + $0xb0] sm:$0xff] %v866_v40 }
 0x190   :  { %v829_v42 = vpop.f32.mrf.mxu3 }
 0x191   :  { %v830_v43 = vadd.f32 %v829_v42, %v764_v39 }
 0x192   :  { %v702_v44 = vpop.f32.mrf.mxu1 }
 0x193   :  { %v867_v45 = vadd.f32 %v830_v43, %v1154_v13  ;;  %v703_v46 = vadd.f32 %v702_v44, %v637_v41 }
 0x195   :  { %v767_v47 = vpop.f32.mrf.mxu2  ;;  %899 = vst [vmem:[%s1285_s5 + $0xb8] sm:$0xff] %v867_v45  ;;  %v868_v48 = vadd.f32 %v703_v46, %v1148_v8 }
 0x197   :  { %v640_v49 = vpop.f32.mrf.mxu0  ;;  %900 = vst [vmem:[%s1285_s5 + $0xc0] sm:$0xff] %v868_v48 }
 0x198   :  { %v832_v50 = vpop.f32.mrf.mxu3 }
 0x199   :  { %v833_v51 = vadd.f32 %v832_v50, %v767_v47 }
 0x19a   :  { %v705_v52 = vpop.f32.mrf.mxu1 }
 0x19b   :  { %v869_v53 = vadd.f32 %v833_v51, %v1154_v13  ;;  %v706_v54 = vadd.f32 %v705_v52, %v640_v49 }
 0x19d   :  { %v770_v55 = vpop.f32.mrf.mxu2  ;;  %901 = vst [vmem:[%s1285_s5 + $0xc8] sm:$0xff] %v869_v53  ;;  %v870_v56 = vadd.f32 %v706_v54, %v1148_v8 }
 0x19f   :  { %v643_v57 = vpop.f32.mrf.mxu0  ;;  %902 = vst [vmem:[%s1285_s5 + $0xd0] sm:$0xff] %v870_v56 }
 0x1a0   :  { %v835_v58 = vpop.f32.mrf.mxu3 }
 0x1a1   :  { %v836_v59 = vadd.f32 %v835_v58, %v770_v55 }
 0x1a2   :  { %v708_v60 = vpop.f32.mrf.mxu1 }
 0x1a3   :  { %v871_v61 = vadd.f32 %v836_v59, %v1154_v13  ;;  %v709_v62 = vadd.f32 %v708_v60, %v643_v57 }
 0x1a5   :  { %v773_v63 = vpop.f32.mrf.mxu2  ;;  %903 = vst [vmem:[%s1285_s5 + $0xd8] sm:$0xff] %v871_v61  ;;  %v872_v0 = vadd.f32 %v709_v62, %v1148_v8 }
 0x1a7   :  { %904 = vst [vmem:[%s1285_s5 + $0xe0] sm:$0xff] %v872_v0  ;;  %v646_v2 = vpop.f32.mrf.mxu0 }
 0x1a8   :  { %v838_v1 = vpop.f32.mrf.mxu3 }
 0x1a9   :  { %v839_v3 = vadd.f32 %v838_v1, %v773_v63 }
 0x1aa   :  { %v711_v4 = vpop.f32.mrf.mxu1 }
 0x1ab   :  { %v873_v5 = vadd.f32 %v839_v3, %v1154_v13  ;;  %v712_v6 = vadd.f32 %v711_v4, %v646_v2 }
 0x1ad   :  { %905 = vst [vmem:[%s1285_s5 + $0xe8] sm:$0xff] %v873_v5  ;;  %v874_v7 = vadd.f32 %v712_v6, %v1148_v8  ;;  %v776_v33 = vpop.f32.mrf.mxu2 }
 0x1af   :  { %906 = vst [vmem:[%s1285_s5 + $0xf0] sm:$0xff] %v874_v7 }
 0x1b0   :  { %v841_v9 = vpop.f32.mrf.mxu3 }
 0x1b1   :  { %v842_v10 = vadd.f32 %v841_v9, %v776_v33 }
 0x1b3   :  { %v875_v11 = vadd.f32 %v842_v10, %v1154_v13 }
 0x1b5   :  { %907 = vst [vmem:[%s1285_s5 + $0xf8] sm:$0xff] %v875_v11 }
 0x1b6   :  { %912 = vsyncpa [#allocation3], 1 }
 0x1b7   :  { %913 = vsyncpa [#allocation5], 1 }

</bundles_post_ra>
